<compile_context>
chip_gen: v7x
topology: tpu7x:2x2x1
jax: 0.10.0
libtpu: 0.0.40
codegen_flags: <defaults>
</compile_context>

<pallas_src>
import math
from functools import partial

import jax
import jax.numpy as jnp
from jax.experimental import pallas as pl
from jax.experimental.pallas import tpu as pltpu

LANE = 128  # TPU lane width


def _round_up(v, m):
    return (v + m - 1) // m * m


def _choose_tile_n(total, max_tile, mult=LANE):
    """Largest multiple of `mult` that divides `total` and is <= max_tile."""
    best = mult
    t = mult
    limit = min(total, max_tile)
    while t <= limit:
        if total % t == 0:
            best = t
        t += mult
    return best


# --------------------------------------------------------------------------
# Kernel
# --------------------------------------------------------------------------
def _taylor_kan_kernel(x_ref, w_ref, bias_ref, o_ref):
    """Computes one (TM, TN) output tile.

    x_ref:    (TM, in_pad)           input rows, features zero-padded to 128*k
    w_ref:    (order*in_pad, TN)     K-stacked [W_base^T; C_1; ...; C_{order-1}]
    bias_ref: (1, TN)                bias + sum_i C_0[i, :]   (order-0 term folded)
    o_ref:    (TM, TN)
    """
    in_pad = x_ref.shape[1]
    order = w_ref.shape[0] // in_pad  # static

    x = x_ref[...]
    xf = x.astype(jnp.float32)

    # Elementwise pieces, then stack along K so the whole layer is ONE matmul.
    silu = xf * jax.nn.sigmoid(xf)              # computed in f32 (EUP exp)
    parts = [silu.astype(x.dtype)]
    xp = xf
    for _ in range(1, order):                   # order is small & static
        parts.append(xp.astype(x.dtype))        # x^1, x^2, ..., x^(order-1)
        xp = xp * xf
    xs = jnp.concatenate(parts, axis=-1)        # (TM, order*in_pad), 128-aligned chunks

    acc = jnp.dot(xs, w_ref[...], preferred_element_type=jnp.float32)
    acc += bias_ref[...].astype(jnp.float32)    # broadcast (1, TN) over rows
    o_ref[...] = acc.astype(o_ref.dtype)


# --------------------------------------------------------------------------
# One-time parameter packing (hoisted out of the forward path)
# --------------------------------------------------------------------------
def prepare_params(base_weight, taylor_coeffs, bias=None):
    """Pack PyTorch-layout params into kernel layout.

    base_weight:   (out, in)
    taylor_coeffs: (out, in, order)
    bias:          (out,) or None

    Returns:
      w_stacked: (order * in_pad, out_pad)  == [W_base^T; C_1; ...; C_{order-1}]
      bias_eff:  (1, out_pad)               == bias + sum_i C_0[i, :]
    """
    out_features, in_features = base_weight.shape
    order = taylor_coeffs.shape[-1]
    in_pad = _round_up(in_features, LANE)
    out_pad = _round_up(out_features, LANE)

    def pad_io(m):  # (in, out) -> (in_pad, out_pad), zero padded
        return jnp.pad(m, ((0, in_pad - in_features), (0, out_pad - out_features)))

    blocks = [pad_io(base_weight.T)]
    for p in range(1, order):
        blocks.append(pad_io(taylor_coeffs[:, :, p].T))
    w_stacked = jnp.concatenate(blocks, axis=0)          # (order*in_pad, out_pad)

    bias_eff = taylor_coeffs[:, :, 0].sum(axis=1)        # exact fold of x**0 term
    if bias is not None:
        bias_eff = bias_eff + bias
    bias_eff = jnp.pad(bias_eff, (0, out_pad - out_features)).reshape(1, out_pad)
    return w_stacked, bias_eff


# --------------------------------------------------------------------------
# Forward
# --------------------------------------------------------------------------
@partial(jax.jit, static_argnames=("in_features", "out_features", "block_m", "block_n"))
def taylor_kan_linear(x, w_stacked, bias_eff, *, in_features, out_features,
                      block_m=256, block_n=512):
    """x: (..., in_features). Returns (..., out_features)."""
    orig_shape = x.shape
    x2d = x.reshape(-1, in_features)
    batch = x2d.shape[0]

    k_total, out_pad = w_stacked.shape
    in_pad = _round_up(in_features, LANE)

    # Tile sizes (divide the padded extents exactly; multiples of (8, 128)).
    tm = min(block_m, _round_up(batch, 8))
    b_pad = _round_up(batch, tm)
    tn = _choose_tile_n(out_pad, block_n)

    # Zero-pad rows / features; silu(0)==0 and 0**p==0 (p>=1) so padding is inert.
    x_pad = jnp.pad(x2d, ((0, b_pad - batch), (0, in_pad - in_features)))

    out = pl.pallas_call(
        _taylor_kan_kernel,
        out_shape=jax.ShapeDtypeStruct((b_pad, out_pad), x.dtype),
        grid_spec=pltpu.PrefetchScalarGridSpec(
            num_scalar_prefetch=0,
            grid=(b_pad // tm, out_pad // tn),
            in_specs=[
                pl.BlockSpec((tm, in_pad), lambda i, j: (i, 0)),     # x rows
                pl.BlockSpec((k_total, tn), lambda i, j: (0, j)),    # stacked weights
                pl.BlockSpec((1, tn), lambda i, j: (0, j)),          # effective bias
            ],
            out_specs=pl.BlockSpec((tm, tn), lambda i, j: (i, j)),
        ),
        compiler_params=pltpu.CompilerParams(
            dimension_semantics=("parallel", "parallel")),
    )(x_pad, w_stacked, bias_eff)

    out = out[:batch, :out_features]
    return out.reshape(*orig_shape[:-1], out_features)


# --------------------------------------------------------------------------
# Init mirroring reset_parameters(), pure-JAX reference, self-test
# --------------------------------------------------------------------------
def init_params(key, in_features, out_features, order=3,
                scale_base=1.0, scale_taylor=1.0):
    k_w, k_c, k_b = jax.random.split(key, 3)
    a = math.sqrt(5) * scale_base
    gain = math.sqrt(2.0 / (1.0 + a * a))
    bound_w = gain * math.sqrt(3.0 / in_features)
    base_weight = jax.random.uniform(
        k_w, (out_features, in_features), jnp.float32, -bound_w, bound_w)
    std = scale_taylor / (in_features * math.sqrt(order))
    taylor_coeffs = std * jax.random.normal(
        k_c, (out_features, in_features, order), jnp.float32)
    bound_b = 1.0 / math.sqrt(in_features)
    bias = jax.random.uniform(
        k_b, (out_features,), jnp.float32, -bound_b, bound_b)
    return base_weight, taylor_coeffs, bias


def _reference(x, base_weight, taylor_coeffs, bias):
    """Pure-JAX reference matching the PyTorch forward."""
    in_features = base_weight.shape[1]
    orig_shape = x.shape
    x2d = x.reshape(-1, in_features)
    base = jax.nn.silu(x2d) @ base_weight.T
    order = taylor_coeffs.shape[-1]
    powers = jnp.arange(order)
    x_powers = x2d[:, None, :, None] ** powers[None, None, None, :]
    taylor = (x_powers * taylor_coeffs[None]).sum(axis=3).sum(axis=2)
    out = base + taylor + bias
    return out.reshape(*orig_shape[:-1], base_weight.shape[0])


if __name__ == "__main__":
    in_features, out_features, order = 32, 16, 3
    key = jax.random.PRNGKey(0)
    k_params, k_x = jax.random.split(key)

    base_weight, taylor_coeffs, bias = init_params(
        k_params, in_features, out_features, order)

    # One-time parameter packing (not on the per-call path).
    w_stacked, bias_eff = prepare_params(base_weight, taylor_coeffs, bias)

    # Small input, feature dim last: (batch=2, seq=8, in_features=32)
    x = jax.random.normal(k_x, (2, 8, in_features), jnp.float32)

    out = taylor_kan_linear(x, w_stacked, bias_eff,
                            in_features=in_features, out_features=out_features)
    out = jax.block_until_ready(out)

    ref = _reference(x, base_weight, taylor_coeffs, bias)
    assert out.shape == (2, 8, out_features), out.shape
    assert jnp.allclose(out, ref, atol=2e-4, rtol=2e-4), (
        float(jnp.max(jnp.abs(out - ref))))

    print("KERNEL_OK")
</pallas_src>

<mosaic_0001>
module attributes {stable_mosaic.version = 11 : i64} {
  func.func @_taylor_kan_kernel(%arg0: i32, %arg1: i32, %arg2: memref<16x128xf32, #tpu.memory_space<vmem>>, %arg3: memref<384x128xf32, #tpu.memory_space<vmem>>, %arg4: memref<1x128xf32, #tpu.memory_space<vmem>>, %arg5: memref<16x128xf32, #tpu.memory_space<vmem>>) attributes {dimension_semantics = [#tpu.dimension_semantics<parallel>, #tpu.dimension_semantics<parallel>], iteration_bounds = array<i64: 1, 1>, scalar_prefetch = 0 : i64, scratch_operands = 0 : i64, tpu.core_type = #tpu.core_type<tc>, window_params = [{transform_indices = @transform_0, window_bounds = array<i64: 16, 128>}, {transform_indices = @transform_1, window_bounds = array<i64: 384, 128>}, {transform_indices = @transform_2, window_bounds = array<i64: 1, 128>}, {transform_indices = @transform_3, window_bounds = array<i64: 16, 128>}]} {
    %c0 = arith.constant 0 : index
    %c0_0 = arith.constant 0 : index
    %0 = vector.load %arg2[%c0, %c0_0] : memref<16x128xf32, #tpu.memory_space<vmem>>, vector<16x128xf32>
    %1 = arith.negf %0 : vector<16x128xf32>
    %2 = math.exp %1 : vector<16x128xf32>
    %cst = arith.constant 1.000000e+00 : f32
    %3 = vector.broadcast %cst : f32 to vector<16x128xf32>
    %4 = arith.addf %3, %2 : vector<16x128xf32>
    %5 = arith.divf %3, %4 : vector<16x128xf32>
    %6 = arith.mulf %0, %5 : vector<16x128xf32>
    %7 = arith.mulf %0, %0 : vector<16x128xf32>
    %8 = tpu.concatenate %6, %0, %7 in 1 : vector<16x128xf32>, vector<16x128xf32>, vector<16x128xf32> -> vector<16x384xf32>
    %c0_1 = arith.constant 0 : index
    %c0_2 = arith.constant 0 : index
    %9 = vector.load %arg3[%c0_1, %c0_2] : memref<384x128xf32, #tpu.memory_space<vmem>>, vector<384x128xf32>
    %cst_3 = arith.constant dense<0.000000e+00> : vector<16x128xf32>
    %10 = tpu.matmul %8, %9, %cst_3 {dimension_numbers = #tpu.dot_dimension_numbers<[1], [0], [0], [1], [0, 0, 1, 1], [], []>} : vector<16x384xf32>, vector<384x128xf32>, vector<16x128xf32> -> vector<16x128xf32>
    %c0_4 = arith.constant 0 : index
    %c0_5 = arith.constant 0 : index
    %11 = vector.load %arg4[%c0_4, %c0_5] : memref<1x128xf32, #tpu.memory_space<vmem>>, vector<1x128xf32>
    %12 = vector.broadcast %11 : vector<1x128xf32> to vector<16x128xf32>
    %13 = arith.addf %10, %12 : vector<16x128xf32>
    %c0_6 = arith.constant 0 : index
    %c0_7 = arith.constant 0 : index
    %14 = vector.load %arg5[%c0_6, %c0_7] : memref<16x128xf32, #tpu.memory_space<vmem>>, vector<16x128xf32>
    tpu.vector_store %arg5[%c0_6, %c0_7], %13 {strides = array<i32>} : memref<16x128xf32, #tpu.memory_space<vmem>>, vector<16x128xf32>,
    return
  }
  func.func @transform_0(%arg0: i32, %arg1: i32) -> (i32, i32) {
    %c0_i32 = arith.constant 0 : i32
    %c0_i32_0 = arith.constant 0 : i32
    return %arg0, %c0_i32 : i32, i32
  }
  func.func @transform_1(%arg0: i32, %arg1: i32) -> (i32, i32) {
    %c0_i32 = arith.constant 0 : i32
    %c0_i32_0 = arith.constant 0 : i32
    return %c0_i32, %arg1 : i32, i32
  }
  func.func @transform_2(%arg0: i32, %arg1: i32) -> (i32, i32) {
    %c0_i32 = arith.constant 0 : i32
    %c0_i32_0 = arith.constant 0 : i32
    return %c0_i32, %arg1 : i32, i32
  }
  func.func @transform_3(%arg0: i32, %arg1: i32) -> (i32, i32) {
    %c0_i32 = arith.constant 0 : i32
    return %arg0, %arg1 : i32, i32
  }
}

</mosaic_0001>

<bundles_post_ra>
// kernel: taylor_kan_linear.1
= control target key start
LH: loop header
LB: loop body
LE: loop exit
PB: predicated region body
PF: predicated region fallthrough
CT: control target
= control target key end

     0   :  { %8 = vsyncpa [#allocation3], 0  ;;  %s451_s12 = smov [#allocation2]   ;;  %s508_s0 = inlined_call_operand.vmem [shape: f32[16,128], index: 0, kind: input, shape index: {}]   ;;  %s509_s1 = inlined_call_operand.hbm [shape: f32[384,128], index: 1, kind: input, shape index: {}]   ;;  %s510_s2 = inlined_call_operand.vmem [shape: f32[1,128], index: 2, kind: input, shape index: {}]   ;;  %s511_s3 = inlined_call_operand.vmem [shape: f32[16,128], index: 3, kind: output, shape index: {}]  }
   0x1   :  { %s16_s13 = sshll.u32 %s451_s12, 4  ;;  %s427_s16 = scalar_lea.hbm %s509_s1, 6144  ;;  %s17_s13 = int_to_ptr.vmem [resolvable:$true] %s16_s13 }
   0x2   :  { %p428_p0 = scmp.ne.s32.totalorder %s509_s1, %s427_s16  ;;  %p431_p1 = scmp.lt.u32.totalorder %s427_s16, %s509_s1 }
   0x4   :  { %p433_p2 = pnand %p431_p1, %p428_p0 }
   0x6   :  { %436 = shalt.err (!%p433_p2)
}
   0x7   :  { %s437_s21 = scalar_lea.vmem %s17_s13, 6144  ;;  %p442_p4 = scmp.lt.s32.totalorder %s17_s13, %s17_s13 }
   0x8   :  { %p438_p3 = scmp.ne.s32.totalorder %s17_s13, %s437_s21  ;;  %p443_p5 = scmp.lt.s32.totalorder %s437_s21, %s437_s21 }
   0xa   :  { %p444_p6 = por %p443_p5, %p442_p4 }
   0xc   :  { %p445_p7 = pnand %p444_p6, %p438_p3 }
   0xe   :  { %448 = shalt.err (!%p445_p7)
}
   0xf   :  { %s452_s22 = smov 128   ;;  %s453_s23 = smov 8  }
  0x10   :  { %22 = dma.hbm_to_vmem [thread:$0]  %s509_s1, 6144, %s17_s13, [#allocation3], %s452_s22, %s452_s22, %s453_s23  }
  0x11   :  { %449 = dma.done.wait [#allocation3], 6144  }
  0x12   :  { %450 = vsyncadd [#allocation3], 4294961152  ;;  %v62_v0 = vld [vmem:[#allocation2 + $0x80] sm:$0xff]  ;;  %v63_v1 = vld [vmem:[#allocation2 + $0x88] sm:$0xff] }
  0x13   :  { %v46_v2 = vld [vmem:[#allocation2] sm:$0xff]  ;;  %v352_v3 = vpack.c.bf16 %v63_v1, %v62_v0  ;;  %v47_v4 = vld [vmem:[#allocation2 + $0x8] sm:$0xff]  ;;  %v64_v5 = vld [vmem:[#allocation2 + $0x90] sm:$0xff] }
  0x14   :  { %v65_v6 = vld [vmem:[#allocation2 + $0x98] sm:$0xff]  ;;  %v354_v7 = vpack.c.bf16 %v47_v4, %v46_v2  ;;  %v78_v9 = vld [vmem:[#allocation2 + $0x100] sm:$0xff]  ;;  %v79_v10 = vld [vmem:[#allocation2 + $0x108] sm:$0xff] }
  0x15   :  { %v356_v8 = vpack.c.bf16 %v65_v6, %v64_v5  ;;  %v48_v11 = vld [vmem:[#allocation2 + $0x10] sm:$0xff]  ;;  %353 = vmatprep.subr.bf16.mxu0 %v352_v3  ;;  %v384_v12 = vpack.c.bf16 %v79_v10, %v78_v9  ;;  %v49_v13 = vld [vmem:[#allocation2 + $0x18] sm:$0xff]  ;;  %v66_v14 = vld [vmem:[#allocation2 + $0xa0] sm:$0xff] }
  0x16   :  { %v67_v15 = vld [vmem:[#allocation2 + $0xa8] sm:$0xff]  ;;  %355 = vmatpush3.bf16.msra.mxu0 %v354_v7  ;;  %v358_v16 = vpack.c.bf16 %v49_v13, %v48_v11  ;;  %v80_v17 = vld [vmem:[#allocation2 + $0x110] sm:$0xff]  ;;  %v81_v18 = vld [vmem:[#allocation2 + $0x118] sm:$0xff] }
  0x17   :  { %357 = vmatprep.subr.bf16.mxu0 %v356_v8  ;;  %385 = vmatprep.subr.bf16.mxu1 %v384_v12  ;;  %v360_v19 = vpack.c.bf16 %v67_v15, %v66_v14  ;;  %v388_v20 = vpack.c.bf16 %v81_v18, %v80_v17  ;;  %v50_v21 = vld [vmem:[#allocation2 + $0x20] sm:$0xff]  ;;  %v51_v22 = vld [vmem:[#allocation2 + $0x28] sm:$0xff]  ;;  %v68_v23 = vld [vmem:[#allocation2 + $0xb0] sm:$0xff] }
  0x18   :  { %387 = vmatpush3.bf16.msra.mxu1 %v384_v12  ;;  %v69_v24 = vld [vmem:[#allocation2 + $0xb8] sm:$0xff]  ;;  %v82_v25 = vld [vmem:[#allocation2 + $0x120] sm:$0xff]  ;;  %v83_v26 = vld [vmem:[#allocation2 + $0x128] sm:$0xff]  ;;  %v362_v28 = vpack.c.bf16 %v51_v22, %v50_v21 }
  0x19   :  { %389 = vmatprep.subr.bf16.mxu1 %v388_v20  ;;  %v392_v27 = vpack.c.bf16 %v83_v26, %v82_v25  ;;  %v84_v29 = vld [vmem:[#allocation2 + $0x130] sm:$0xff]  ;;  %v85_v30 = vld [vmem:[#allocation2 + $0x138] sm:$0xff]  ;;  %v364_v31 = vpack.c.bf16 %v69_v24, %v68_v23  ;;  %v70_v34 = vld [vmem:[#allocation2 + $0xc0] sm:$0xff] }
  0x1a   :  { %359 = vmatpush3.bf16.msra.mxu0 %v358_v16  ;;  %v52_v32 = vld [vmem:[#allocation2 + $0x30] sm:$0xff]  ;;  %v53_v33 = vld [vmem:[#allocation2 + $0x38] sm:$0xff]  ;;  %v71_v35 = vld [vmem:[#allocation2 + $0xc8] sm:$0xff]  ;;  %v396_v36 = vpack.c.bf16 %v85_v30, %v84_v29 }
  0x1b   :  { %361 = vmatprep.subr.bf16.mxu0 %v360_v19  ;;  %v366_v37 = vpack.c.bf16 %v53_v33, %v52_v32  ;;  %v86_v38 = vld [vmem:[#allocation2 + $0x140] sm:$0xff]  ;;  %v87_v39 = vld [vmem:[#allocation2 + $0x148] sm:$0xff]  ;;  %v368_v40 = vpack.c.bf16 %v71_v35, %v70_v34  ;;  %v72_v43 = vld [vmem:[#allocation2 + $0xd0] sm:$0xff] }
  0x1c   :  { %391 = vmatpush3.bf16.msra.mxu1 %v388_v20  ;;  %v54_v41 = vld [vmem:[#allocation2 + $0x40] sm:$0xff]  ;;  %v55_v42 = vld [vmem:[#allocation2 + $0x48] sm:$0xff]  ;;  %v73_v44 = vld [vmem:[#allocation2 + $0xd8] sm:$0xff]  ;;  %v400_v45 = vpack.c.bf16 %v87_v39, %v86_v38 }
  0x1d   :  { %393 = vmatprep.subr.bf16.mxu1 %v392_v27  ;;  %v489_v46 = vld [vmem:[%s508_s0] sm:$0xff]  ;;  %v370_v47 = vpack.c.bf16 %v55_v42, %v54_v41  ;;  %v88_v48 = vld [vmem:[#allocation2 + $0x150] sm:$0xff]  ;;  %v89_v49 = vld [vmem:[#allocation2 + $0x158] sm:$0xff]  ;;  %v372_v53 = vpack.c.bf16 %v73_v44, %v72_v43 }
  0x1e   :  { %363 = vmatpush3.bf16.msra.mxu0 %v362_v28  ;;  %v258_v50 = vmul.f32 -1.442695, %v489_v46  ;;  %165 = vmatprep.mubr.f32.mxu0 %v489_v46  ;;  %v29_v51 = vld [vmem:[%s508_s0 + $0x8] sm:$0xff]  ;;  %v44_v52 = vmul.f32 %v489_v46, %v489_v46  ;;  %v56_v54 = vld [vmem:[#allocation2 + $0x50] sm:$0xff]  ;;  %v57_v55 = vld [vmem:[#allocation2 + $0x58] sm:$0xff]  ;;  %v404_v59 = vpack.c.bf16 %v89_v49, %v88_v48 }
  0x1f   :  { %365 = vmatprep.subr.bf16.mxu0 %v364_v31  ;;  %v259_v56 = vmul.f32 -1.442695, %v29_v51  ;;  %v74_v57 = vld [vmem:[#allocation2 + $0xe0] sm:$0xff]  ;;  %v75_v58 = vld [vmem:[#allocation2 + $0xe8] sm:$0xff]  ;;  %v374_v60 = vpack.c.bf16 %v57_v55, %v56_v54  ;;  %v76_v2 = vld [vmem:[#allocation2 + $0xf0] sm:$0xff]  ;;  %v45_v17 = vmul.f32 %v29_v51, %v29_v51 }
  0x20   :  { %395 = vmatpush3.bf16.msra.mxu1 %v392_v27  ;;  %419 = vpow2.f32 %v258_v50  ;;  %349 = vmatprep.mubr.f32.mxu1 %v44_v52  ;;  %v90_v61 = vld [vmem:[#allocation2 + $0x160] sm:$0xff]  ;;  %v91_v62 = vld [vmem:[#allocation2 + $0x168] sm:$0xff]  ;;  %v376_v63 = vpack.c.bf16 %v75_v58, %v74_v57  ;;  %v77_v3 = vld [vmem:[#allocation2 + $0xf8] sm:$0xff] }
  0x21   :  { %397 = vmatprep.subr.bf16.mxu1 %v396_v36  ;;  %421 = vpow2.f32 %v259_v56  ;;  %v58_v0 = vld [vmem:[#allocation2 + $0x60] sm:$0xff]  ;;  %v59_v1 = vld [vmem:[#allocation2 + $0x68] sm:$0xff]  ;;  %v408_v4 = vpack.c.bf16 %v91_v62, %v90_v61  ;;  %v92_v6 = vld [vmem:[#allocation2 + $0x170] sm:$0xff]  ;;  %v380_v8 = vpack.c.bf16 %v77_v3, %v76_v2 }
  0x22   :  { %367 = vmatpush3.bf16.msra.mxu0 %v366_v37  ;;  %v378_v5 = vpack.c.bf16 %v59_v1, %v58_v0  ;;  %v93_v7 = vld [vmem:[#allocation2 + $0x178] sm:$0xff]  ;;  %v60_v9 = vld [vmem:[#allocation2 + $0x70] sm:$0xff]  ;;  %v260_v26 = vld [vmem:[%s510_s2] ss:$0 sm:$0xff] }
  0x23   :  { %369 = vmatprep.subr.bf16.mxu0 %v368_v40  ;;  %v61_v10 = vld [vmem:[#allocation2 + $0x78] sm:$0xff]  ;;  %v412_v11 = vpack.c.bf16 %v93_v7, %v92_v6 }
  0x24   :  { %399 = vmatpush3.bf16.msra.mxu1 %v396_v36  ;;  %v382_v13 = vpack.c.bf16 %v61_v10, %v60_v9 }
  0x25   :  { %401 = vmatprep.subr.bf16.mxu1 %v400_v45 }
  0x26   :  { %371 = vmatpush3.bf16.msra.mxu0 %v370_v47 }
  0x27   :  { %373 = vmatprep.subr.bf16.mxu0 %v372_v53 }
  0x28   :  { %403 = vmatpush3.bf16.msra.mxu1 %v400_v45 }
  0x29   :  { %405 = vmatprep.subr.bf16.mxu1 %v404_v59 }
  0x2a   :  { %375 = vmatpush3.bf16.msra.mxu0 %v374_v60  ;;  %v420_v12 = vpop.eup %419 }
  0x2b   :  { %377 = vmatprep.subr.bf16.mxu0 %v376_v63  ;;  %v422_v14 = vpop.eup %421  ;;  %v36_v15 = vadd.f32 1.0, %v420_v12 }
  0x2c   :  { %407 = vmatpush3.bf16.msra.mxu1 %v404_v59  ;;  %v37_v16 = vadd.f32 1.0, %v422_v14 }
  0x2d   :  { %409 = vmatprep.subr.bf16.mxu1 %v408_v4  ;;  %423 = vrcp.f32 %v36_v15 }
  0x2e   :  { %379 = vmatpush3.bf16.msra.mxu0 %v378_v5  ;;  %425 = vrcp.f32 %v37_v16 }
  0x2f   :  { %381 = vmatprep.subr.bf16.mxu0 %v380_v8 }
  0x30   :  { %411 = vmatpush3.bf16.msra.mxu1 %v408_v4 }
  0x31   :  { %413 = vmatprep.subr.bf16.mxu1 %v412_v11 }
  0x32   :  { %383 = vmatpush3.bf16.msra.mxu0 %v382_v13 }
  0x34   :  { %415 = vmatpush3.bf16.msra.mxu1 %v412_v11 }
  0x37   :  { %350 = vmatmul.mubr.f32.vlgmr.msra.gmra.mrb[0].mxu1 %v45_v17  ;;  %v424_v18 = vpop.eup %423 }
  0x38   :  { %v426_v19 = vpop.eup %425  ;;  %v42_v20 = vmul.f32 %v424_v18, %v489_v46 }
  0x39   :  { %v43_v21 = vmul.f32 %v426_v19, %v29_v51 }
  0x3a   :  { %166 = vmatmul.mubr.f32.vlgmr.msra.gmra.mrb[0].mxu0 %v42_v20 }
  0x3b   :  { %170 = vmatprep.mubr.f32.mxu0 %v29_v51 }
  0x3e   :  { %171 = vmatmul.mubr.f32.gmra.mrb[2].mxu0 %v43_v21 }
 0x10a   :  { %v351_v22 = vpop.f32.mrb[0].mxu1 }
 0x10b   :  { %v242_v23 = vpop.f32.mrb[1].mxu1 }
 0x10d   :  { %v293_v24 = vpop.f32.mrb[0].mxu0 }
 0x10e   :  { %v294_v25 = vpop.f32.mrb[1].mxu0 }
 0x10f   :  { %v295_v27 = vadd.f32 %v294_v25, %v293_v24 }
 0x111   :  { %v296_v28 = vpop.f32.mrb[2].mxu0  ;;  %v168_v29 = vadd.f32 %v295_v27, %v260_v26 }
 0x112   :  { %v297_v30 = vpop.f32.mrb[3].mxu0 }
 0x113   :  { %v298_v31 = vadd.f32 %v297_v30, %v296_v28  ;;  %v243_v32 = vadd.f32 %v242_v23, %v168_v29 }
 0x115   :  { %v173_v33 = vadd.f32 %v298_v31, %v260_v26  ;;  %251 = vst [vmem:[%s511_s3] sm:$0xff] %v243_v32 }
 0x117   :  { %v248_v34 = vadd.f32 %v351_v22, %v173_v33 }
 0x119   :  { %252 = vst [vmem:[%s511_s3 + $0x8] sm:$0xff] %v248_v34 }
 0x11a   :  { %257 = vsyncpa [#allocation3], 1 }

</bundles_post_ra>
